<compile_context>
chip_gen: v7x
topology: tpu7x:2x2x1
jax: 0.10.0
libtpu: 0.0.40
codegen_flags: <defaults>
</compile_context>

<pallas_src>
import functools

import jax
import jax.numpy as jnp
from jax import lax
from jax.experimental import pallas as pl
from jax.experimental.pallas import tpu as pltpu


def _round_up(n: int, m: int) -> int:
    return ((n + m - 1) // m) * m


def _cdiv(a: int, b: int) -> int:
    return -(-a // b)


# ---------------------------------------------------------------------------
# kernel: one (batch, T_feat-tile) grid point
# ---------------------------------------------------------------------------
def _gaussian_upsample_kernel(lens_ref, x_ref, coef_ref, o_ref, *, tq):
    b = pl.program_id(0)
    qi = pl.program_id(1)

    x = x_ref[0]                      # (T_text_pad, C_pad), compute dtype (bf16 by default)
    a_col = coef_ref[0, 0:1, :]       # (1, T_text_pad)  = 2*delta*c         (0 in padded cols)
    b_col = coef_ref[0, 1:2, :]       # (1, T_text_pad)  = delta*c^2         (1e30 in padded cols)
    out_len = lens_ref[b]             # scalar int32 (SMEM, scalar prefetch)

    # frame indices for this output tile, masked like torch: t = t * y_mask
    t_idx = qi * tq + lax.broadcasted_iota(jnp.int32, (tq, 1), 0)            # (TQ, 1)
    t = t_idx.astype(jnp.float32) * (t_idx < out_len).astype(jnp.float32)

    # expanded square: -delta*(t-c)^2 = -delta*t^2 + t*(2*delta*c) - delta*c^2.
    # The per-row -delta*t^2 constant cancels in softmax and is dropped.
    energy = t * a_col - b_col                                               # (TQ, T_text_pad) f32
    m = jnp.max(energy, axis=-1, keepdims=True)
    e = jnp.exp(energy - m)                                                  # unnormalized weights
    denom = jnp.sum(e, axis=-1, keepdims=True)                               # f32 row sums

    # bf16 weights x bf16 x on the MXU, f32 accumulation; normalize after the contraction.
    acc = jnp.dot(e.astype(x.dtype), x, preferred_element_type=jnp.float32)  # (TQ, C_pad) f32
    o_ref[0] = (acc * pl.reciprocal(denom, approx=True)).astype(o_ref.dtype)


# ---------------------------------------------------------------------------
# wrapper
# ---------------------------------------------------------------------------
def gaussian_upsampling(x, durations, *, delta=0.1, t_feat=None, tq_max=512,
                        matmul_dtype=jnp.bfloat16):
    """Pallas GaussianUpsampling.forward.

    x: (B, T_text, C) float;  durations: (B, T_text) int.
    Returns (upsampled (B, T_feat, C), out_lens (B,)).

    If `t_feat` is None it is derived from the data (one host sync — the torch module's
    output length is data dependent).  Pass a static `t_feat` upper bound to stay fully
    on-device / jit-friendly.  `matmul_dtype=None` keeps the matmul in x's dtype.
    """
    B, T_text, C = x.shape
    out_dtype = x.dtype
    durations = durations.astype(jnp.int32)

    if t_feat is None:
        out_lens_pre = jnp.sum(durations, axis=1)
        # single host sync for both the all-zero check and max(out_lens)
        total, mx = (int(v) for v in jax.device_get(
            jnp.stack([jnp.sum(out_lens_pre), jnp.max(out_lens_pre)])))
        if total == 0:
            # torch edge case: all durations zero -> set to 1 (degenerate case)
            durations = jnp.ones_like(durations)
            mx = T_text
        t_feat = mx
    t_feat = max(int(t_feat), 1)

    out_lens = jnp.sum(durations, axis=1)                                    # (B,)

    # centers c = cumsum(d) - d/2 and the expanded-square column coefficients (cheap (B,T_text) ops)
    dur_f = durations.astype(jnp.float32)
    c = jnp.cumsum(dur_f, axis=-1) - 0.5 * dur_f                             # (B, T_text)
    a_col = (2.0 * float(delta)) * c                                         # 2*delta*c
    b_col = float(delta) * c * c                                             # delta*c^2
    # TODO(synk): the optional padding_mask of the torch module is not implemented; it would
    # be folded in here by setting b_col = 1e30 on masked text positions.

    # pad T_text (matmul K / softmax lane axis) to 128 with exact sentinels,
    # pad C (output lane axis) to 128 for unmasked stores / full MXU N dimension.
    T_pad = _round_up(T_text, 128)
    C_pad = _round_up(C, 128)
    if T_pad != T_text:
        a_col = jnp.pad(a_col, ((0, 0), (0, T_pad - T_text)))
        b_col = jnp.pad(b_col, ((0, 0), (0, T_pad - T_text)), constant_values=1e30)
    coefs = jnp.stack([a_col, b_col], axis=1)                                # (B, 2, T_pad) f32

    x_mm = x.astype(matmul_dtype) if matmul_dtype is not None else x
    if T_pad != T_text or C_pad != C:
        x_mm = jnp.pad(x_mm, ((0, 0), (0, T_pad - T_text), (0, C_pad - C)))

    # balanced T_feat tiling: minimal number of tiles with tq <= tq_max, then even split.
    nq = _cdiv(t_feat, int(tq_max))
    tq = _round_up(_cdiv(t_feat, nq), 8)
    t_feat_pad = tq * nq

    def run(single_buffer_weights: bool):
        def weight_spec(block, index_map):
            # x / coefs block index only changes with b -> double buffering buys nothing
            if single_buffer_weights:
                return pl.BlockSpec(block, index_map, pipeline_mode=pl.Buffered(1))
            return pl.BlockSpec(block, index_map)

        # explicit VMEM budget (v5e default scoped limit is 16 MiB, v7x 32 MiB)
        cd = jnp.dtype(x_mm.dtype).itemsize
        n_buf = 1 if single_buffer_weights else 2
        est = (n_buf * (T_pad * C_pad * cd + 8 * T_pad * 4)
               + 2 * tq * C_pad * jnp.dtype(out_dtype).itemsize
               + 6 * tq * T_pad * 4 + (2 << 20))
        # TODO(synk): if est exceeds ~64 MiB (v7x physical VMEM), add a third grid axis over C
        #             and reuse the softmax weights from a VMEM scratch across C tiles.
        vmem_limit = int(min(64 << 20, max(32 << 20, est)))

        out = pl.pallas_call(
            functools.partial(_gaussian_upsample_kernel, tq=tq),
            out_shape=jax.ShapeDtypeStruct((B, t_feat_pad, C_pad), out_dtype),
            grid_spec=pltpu.PrefetchScalarGridSpec(
                num_scalar_prefetch=1,                 # out_lens -> SMEM (index_maps + kernel)
                grid=(B, nq),
                in_specs=[
                    weight_spec((1, T_pad, C_pad), lambda b, q, lens: (b, 0, 0)),
                    weight_spec((1, 2, T_pad), lambda b, q, lens: (b, 0, 0)),
                ],
                out_specs=pl.BlockSpec((1, tq, C_pad), lambda b, q, lens: (b, q, 0)),
            ),
            compiler_params=pltpu.CompilerParams(
                dimension_semantics=("parallel", "arbitrary"),   # bias megacore sharding to B
                vmem_limit_bytes=vmem_limit),
        )(out_lens, x_mm, coefs)
        jax.block_until_ready(out)
        return out

    try:
        out = run(True)
    except Exception:
        # pl.Buffered(1) / pipeline_mode unsupported on this jax version -> default double-buffer
        out = run(False)

    if t_feat_pad != t_feat or C_pad != C:
        out = out[:, :t_feat, :C]
    return out, out_lens


# ---------------------------------------------------------------------------
# pure-JAX reference (for a sanity check)
# ---------------------------------------------------------------------------
def _reference(x, durations, delta, t_feat):
    out_lens = jnp.sum(durations, axis=1)
    dur_f = durations.astype(jnp.float32)
    t = jnp.arange(t_feat, dtype=jnp.float32)[None, :]
    y_mask = (jnp.arange(t_feat)[None, :] < out_lens[:, None]).astype(jnp.float32)
    t = t * y_mask                                                           # (B, T_feat)
    c = jnp.cumsum(dur_f, axis=-1) - 0.5 * dur_f                             # (B, T_text)
    energy = -delta * (t[:, :, None] - c[:, None, :]) ** 2
    p = jax.nn.softmax(energy, axis=2)
    return jnp.einsum("btk,bkc->btc", p, x.astype(jnp.float32)).astype(x.dtype), out_lens


if __name__ == "__main__":
    B, T_text, C = 2, 8, 32
    key = jax.random.PRNGKey(0)
    kx, kd = jax.random.split(key)
    x = jax.random.normal(kx, (B, T_text, C), jnp.float32)
    durations = jax.random.randint(kd, (B, T_text), 1, 5, jnp.int32)

    y, out_lens = gaussian_upsampling(x, durations, delta=0.1)
    jax.block_until_ready(y)
    jax.block_until_ready(out_lens)

    y_ref, lens_ref = _reference(x, durations, 0.1, y.shape[1])
    assert y.shape == y_ref.shape
    assert jnp.allclose(out_lens, lens_ref)
    # bf16 MXU path + approx reciprocal -> slightly looser tolerance than pure f32
    assert jnp.allclose(y, y_ref, rtol=2e-2, atol=2e-2)

    print("KERNEL_OK")
</pallas_src>

<mosaic_0001>
module attributes {stable_mosaic.version = 11 : i64} {
  func.func @_gaussian_upsample_kernel(%arg0: i32, %arg1: i32, %arg2: memref<2xi32, #tpu.memory_space<smem>>, %arg3: memref<1x128x128xbf16, #tpu.memory_space<vmem>>, %arg4: memref<1x2x128xf32, #tpu.memory_space<vmem>>, %arg5: memref<1x24x128xf32, #tpu.memory_space<vmem>>) attributes {dimension_semantics = [#tpu.dimension_semantics<parallel>, #tpu.dimension_semantics<arbitrary>], iteration_bounds = array<i64: 2, 1>, scalar_prefetch = 1 : i64, scratch_operands = 0 : i64, tpu.core_type = #tpu.core_type<tc>, window_params = [{pipeline_mode = #tpu.pipeline_mode<synchronous>, transform_indices = @transform_0, window_bounds = array<i64: 1, 128, 128>}, {pipeline_mode = #tpu.pipeline_mode<synchronous>, transform_indices = @transform_1, window_bounds = array<i64: 1, 2, 128>}, {transform_indices = @transform_2, window_bounds = array<i64: 1, 24, 128>}]} {
    %c0 = arith.constant 0 : index
    %c0_0 = arith.constant 0 : index
    %c0_1 = arith.constant 0 : index
    %0 = vector.load %arg3[%c0, %c0_0, %c0_1] : memref<1x128x128xbf16, #tpu.memory_space<vmem>>, vector<1x128x128xbf16>
    %1 = vector.shape_cast %0 : vector<1x128x128xbf16> to vector<128x128xbf16>
    %c0_2 = arith.constant 0 : index
    %c0_3 = arith.constant 0 : index
    %c0_4 = arith.constant 0 : index
    %2 = vector.load %arg4[%c0_2, %c0_3, %c0_4] : memref<1x2x128xf32, #tpu.memory_space<vmem>>, vector<1x1x128xf32>
    %3 = vector.shape_cast %2 : vector<1x1x128xf32> to vector<1x128xf32>
    %c0_5 = arith.constant 0 : index
    %c1 = arith.constant 1 : index
    %c0_6 = arith.constant 0 : index
    %4 = vector.load %arg4[%c0_5, %c1, %c0_6] : memref<1x2x128xf32, #tpu.memory_space<vmem>>, vector<1x1x128xf32>
    %5 = vector.shape_cast %4 : vector<1x1x128xf32> to vector<1x128xf32>
    %6 = arith.index_cast %arg0 : i32 to index
    %7 = memref.load %arg2[%6] : memref<2xi32, #tpu.memory_space<smem>>
    %c24_i32 = arith.constant 24 : i32
    %8 = arith.muli %arg1, %c24_i32 : i32
    %9 = tpu.iota {dimensions = array<i32: 0>} : vector<24x1xi32>
    %10 = vector.broadcast %8 : i32 to vector<24x1xi32>
    %11 = arith.addi %10, %9 : vector<24x1xi32>
    %12 = arith.sitofp %11 : vector<24x1xi32> to vector<24x1xf32>
    %13 = vector.broadcast %7 : i32 to vector<24x1xi32>
    %14 = arith.cmpi slt, %11, %13 : vector<24x1xi32>
    %15 = arith.extui %14 : vector<24x1xi1> to vector<24x1xi32>
    %16 = arith.sitofp %15 : vector<24x1xi32> to vector<24x1xf32>
    %17 = arith.mulf %12, %16 : vector<24x1xf32>
    %18 = vector.broadcast %17 : vector<24x1xf32> to vector<24x128xf32>
    %19 = vector.broadcast %3 : vector<1x128xf32> to vector<24x128xf32>
    %20 = arith.mulf %18, %19 : vector<24x128xf32>
    %21 = vector.broadcast %5 : vector<1x128xf32> to vector<24x128xf32>
    %22 = arith.subf %20, %21 : vector<24x128xf32>
    %cst = arith.constant dense<0xFF800000> : vector<24xf32>
    %23 = vector.multi_reduction <maximumf>, %22, %cst [1] : vector<24x128xf32> to vector<24xf32>
    %24 = vector.shape_cast %23 : vector<24xf32> to vector<24x1xf32>
    %25 = vector.broadcast %24 : vector<24x1xf32> to vector<24x128xf32>
    %26 = arith.subf %22, %25 : vector<24x128xf32>
    %27 = math.exp %26 : vector<24x128xf32>
    %cst_7 = arith.constant dense<0.000000e+00> : vector<24xf32>
    %28 = vector.multi_reduction <add>, %27, %cst_7 [1] : vector<24x128xf32> to vector<24xf32>
    %29 = vector.shape_cast %28 : vector<24xf32> to vector<24x1xf32>
    %30 = arith.truncf %27 : vector<24x128xf32> to vector<24x128xbf16>
    %cst_8 = arith.constant dense<0.000000e+00> : vector<24x128xf32>
    %31 = tpu.matmul %30, %1, %cst_8 {dimension_numbers = #tpu.dot_dimension_numbers<[1], [0], [0], [1], [0, 0, 1, 1], [], []>} : vector<24x128xbf16>, vector<128x128xbf16>, vector<24x128xf32> -> vector<24x128xf32>
    %32 = tpu.reciprocal %29 {approx = true} : vector<24x1xf32> -> vector<24x1xf32>
    %33 = vector.broadcast %32 : vector<24x1xf32> to vector<24x128xf32>
    %34 = arith.mulf %31, %33 : vector<24x128xf32>
    %c0_9 = arith.constant 0 : index
    %c0_10 = arith.constant 0 : index
    %c0_11 = arith.constant 0 : index
    %35 = vector.load %arg5[%c0_9, %c0_10, %c0_11] : memref<1x24x128xf32, #tpu.memory_space<vmem>>, vector<1x24x128xf32>
    %36 = vector.shape_cast %35 : vector<1x24x128xf32> to vector<24x128xf32>
    %37 = vector.shape_cast %34 : vector<24x128xf32> to vector<1x24x128xf32>
    tpu.vector_store %arg5[%c0_9, %c0_10, %c0_11], %37 {strides = array<i32>} : memref<1x24x128xf32, #tpu.memory_space<vmem>>, vector<1x24x128xf32>,
    return
  }
  func.func @transform_0(%arg0: i32, %arg1: i32, %arg2: memref<2xi32, #tpu.memory_space<smem>>) -> (i32, i32, i32) {
    %c0_i32 = arith.constant 0 : i32
    %c0_i32_0 = arith.constant 0 : i32
    %c0_i32_1 = arith.constant 0 : i32
    return %arg0, %c0_i32, %c0_i32_0 : i32, i32, i32
  }
  func.func @transform_1(%arg0: i32, %arg1: i32, %arg2: memref<2xi32, #tpu.memory_space<smem>>) -> (i32, i32, i32) {
    %c0_i32 = arith.constant 0 : i32
    %c0_i32_0 = arith.constant 0 : i32
    %c0_i32_1 = arith.constant 0 : i32
    return %arg0, %c0_i32, %c0_i32_0 : i32, i32, i32
  }
  func.func @transform_2(%arg0: i32, %arg1: i32, %arg2: memref<2xi32, #tpu.memory_space<smem>>) -> (i32, i32, i32) {
    %c0_i32 = arith.constant 0 : i32
    %c0_i32_0 = arith.constant 0 : i32
    return %arg0, %arg1, %c0_i32 : i32, i32, i32
  }
}

module attributes {stable_mosaic.version = 11 : i64} {
  func.func @_gaussian_upsample_kernel(%arg0: i32, %arg1: i32, %arg2: memref<2xi32, #tpu.memory_space<smem>>, %arg3: memref<1x128x128xbf16, #tpu.memory_space<vmem>>, %arg4: memref<1x2x128xf32, #tpu.memory_space<vmem>>, %arg5: memref<1x24x128xf32, #tpu.memory_space<vmem>>) attributes {dimension_semantics = [#tpu.dimension_semantics<parallel>, #tpu.dimension_semantics<arbitrary>], iteration_bounds = array<i64: 2, 1>, scalar_prefetch = 1 : i64, scratch_operands = 0 : i64, tpu.core_type = #tpu.core_type<tc>, window_params = [{transform_indices = @transform_0, window_bounds = array<i64: 1, 128, 128>}, {transform_indices = @transform_1, window_bounds = array<i64: 1, 2, 128>}, {transform_indices = @transform_2, window_bounds = array<i64: 1, 24, 128>}]} {
    %c0 = arith.constant 0 : index
    %c0_0 = arith.constant 0 : index
    %c0_1 = arith.constant 0 : index
    %0 = vector.load %arg3[%c0, %c0_0, %c0_1] : memref<1x128x128xbf16, #tpu.memory_space<vmem>>, vector<1x128x128xbf16>
    %1 = vector.shape_cast %0 : vector<1x128x128xbf16> to vector<128x128xbf16>
    %c0_2 = arith.constant 0 : index
    %c0_3 = arith.constant 0 : index
    %c0_4 = arith.constant 0 : index
    %2 = vector.load %arg4[%c0_2, %c0_3, %c0_4] : memref<1x2x128xf32, #tpu.memory_space<vmem>>, vector<1x1x128xf32>
    %3 = vector.shape_cast %2 : vector<1x1x128xf32> to vector<1x128xf32>
    %c0_5 = arith.constant 0 : index
    %c1 = arith.constant 1 : index
    %c0_6 = arith.constant 0 : index
    %4 = vector.load %arg4[%c0_5, %c1, %c0_6] : memref<1x2x128xf32, #tpu.memory_space<vmem>>, vector<1x1x128xf32>
    %5 = vector.shape_cast %4 : vector<1x1x128xf32> to vector<1x128xf32>
    %6 = arith.index_cast %arg0 : i32 to index
    %7 = memref.load %arg2[%6] : memref<2xi32, #tpu.memory_space<smem>>
    %c24_i32 = arith.constant 24 : i32
    %8 = arith.muli %arg1, %c24_i32 : i32
    %9 = tpu.iota {dimensions = array<i32: 0>} : vector<24x1xi32>
    %10 = vector.broadcast %8 : i32 to vector<24x1xi32>
    %11 = arith.addi %10, %9 : vector<24x1xi32>
    %12 = arith.sitofp %11 : vector<24x1xi32> to vector<24x1xf32>
    %13 = vector.broadcast %7 : i32 to vector<24x1xi32>
    %14 = arith.cmpi slt, %11, %13 : vector<24x1xi32>
    %15 = arith.extui %14 : vector<24x1xi1> to vector<24x1xi32>
    %16 = arith.sitofp %15 : vector<24x1xi32> to vector<24x1xf32>
    %17 = arith.mulf %12, %16 : vector<24x1xf32>
    %18 = vector.broadcast %17 : vector<24x1xf32> to vector<24x128xf32>
    %19 = vector.broadcast %3 : vector<1x128xf32> to vector<24x128xf32>
    %20 = arith.mulf %18, %19 : vector<24x128xf32>
    %21 = vector.broadcast %5 : vector<1x128xf32> to vector<24x128xf32>
    %22 = arith.subf %20, %21 : vector<24x128xf32>
    %cst = arith.constant dense<0xFF800000> : vector<24xf32>
    %23 = vector.multi_reduction <maximumf>, %22, %cst [1] : vector<24x128xf32> to vector<24xf32>
    %24 = vector.shape_cast %23 : vector<24xf32> to vector<24x1xf32>
    %25 = vector.broadcast %24 : vector<24x1xf32> to vector<24x128xf32>
    %26 = arith.subf %22, %25 : vector<24x128xf32>
    %27 = math.exp %26 : vector<24x128xf32>
    %cst_7 = arith.constant dense<0.000000e+00> : vector<24xf32>
    %28 = vector.multi_reduction <add>, %27, %cst_7 [1] : vector<24x128xf32> to vector<24xf32>
    %29 = vector.shape_cast %28 : vector<24xf32> to vector<24x1xf32>
    %30 = arith.truncf %27 : vector<24x128xf32> to vector<24x128xbf16>
    %cst_8 = arith.constant dense<0.000000e+00> : vector<24x128xf32>
    %31 = tpu.matmul %30, %1, %cst_8 {dimension_numbers = #tpu.dot_dimension_numbers<[1], [0], [0], [1], [0, 0, 1, 1], [], []>} : vector<24x128xbf16>, vector<128x128xbf16>, vector<24x128xf32> -> vector<24x128xf32>
    %32 = tpu.reciprocal %29 {approx = true} : vector<24x1xf32> -> vector<24x1xf32>
    %33 = vector.broadcast %32 : vector<24x1xf32> to vector<24x128xf32>
    %34 = arith.mulf %31, %33 : vector<24x128xf32>
    %c0_9 = arith.constant 0 : index
    %c0_10 = arith.constant 0 : index
    %c0_11 = arith.constant 0 : index
    %35 = vector.load %arg5[%c0_9, %c0_10, %c0_11] : memref<1x24x128xf32, #tpu.memory_space<vmem>>, vector<1x24x128xf32>
    %36 = vector.shape_cast %35 : vector<1x24x128xf32> to vector<24x128xf32>
    %37 = vector.shape_cast %34 : vector<24x128xf32> to vector<1x24x128xf32>
    tpu.vector_store %arg5[%c0_9, %c0_10, %c0_11], %37 {strides = array<i32>} : memref<1x24x128xf32, #tpu.memory_space<vmem>>, vector<1x24x128xf32>,
    return
  }
  func.func @transform_0(%arg0: i32, %arg1: i32, %arg2: memref<2xi32, #tpu.memory_space<smem>>) -> (i32, i32, i32) {
    %c0_i32 = arith.constant 0 : i32
    %c0_i32_0 = arith.constant 0 : i32
    %c0_i32_1 = arith.constant 0 : i32
    return %arg0, %c0_i32, %c0_i32_0 : i32, i32, i32
  }
  func.func @transform_1(%arg0: i32, %arg1: i32, %arg2: memref<2xi32, #tpu.memory_space<smem>>) -> (i32, i32, i32) {
    %c0_i32 = arith.constant 0 : i32
    %c0_i32_0 = arith.constant 0 : i32
    %c0_i32_1 = arith.constant 0 : i32
    return %arg0, %c0_i32, %c0_i32_0 : i32, i32, i32
  }
  func.func @transform_2(%arg0: i32, %arg1: i32, %arg2: memref<2xi32, #tpu.memory_space<smem>>) -> (i32, i32, i32) {
    %c0_i32 = arith.constant 0 : i32
    %c0_i32_0 = arith.constant 0 : i32
    return %arg0, %arg1, %c0_i32 : i32, i32, i32
  }
}

</mosaic_0001>

<bundles_post_ra>
// kernel: tpu_custom_call.1
= control target key start
LH: loop header
LB: loop body
LE: loop exit
PB: predicated region body
PF: predicated region fallthrough
CT: control target
= control target key end

     0   :  { %s957_s0 = inlined_call_operand.hbm [shape: s32[2], index: 0, kind: input, shape index: {}]   ;;  %s958_s1 = inlined_call_operand.hbm [shape: bf16[2,128,128], index: 1, kind: input, shape index: {}]   ;;  %s959_s2 = inlined_call_operand.vmem [shape: f32[2,2,128], index: 2, kind: input, shape index: {}]   ;;  %s960_s3 = inlined_call_operand.hbm [shape: f32[2,24,128], index: 3, kind: output, shape index: {}]  }
   0x1   :  { %s619_s14 = scalar_lea.hbm %s957_s0, 16 }
   0x2   :  { %p620_p0 = scmp.ne.s32.totalorder %s957_s0, %s619_s14  ;;  %p623_p1 = scmp.lt.u32.totalorder %s619_s14, %s957_s0 }
   0x4   :  { %p625_p2 = pnand %p623_p1, %p620_p0 }
   0x6   :  { %628 = shalt.err (!%p625_p2)  }
   0x7   :  { %s745_s19 = smov [#allocation3]  }
   0x8   :  { %9 = dma.hbm_to_smem %s957_s0, 16, %s745_s19, [#allocation2] }
   0x9   :  { %711 = dma.done.wait [#allocation2], 16 }
   0xa   :  { %712 = vsyncadd [#allocation2], 4294967280 }
   0xb   :  { %11 = sfence }
   0xc   :  { %12 = vsyncpa [#allocation5], 0 }
   0xd   :  { %13 = vsyncpa [#allocation6], 0 }
   0xe   :  { %15 = vsyncpa [#allocation6 + $0x1], 0  ;;  %s785_s22 = smov 0   ;;  %s787_s23 = smov 0  }
   0xf   :  { %s789_s24 = smov 0   ;;  %s791_s25 = smov 0  }
  0x10   :  { %s793_s26 = smov 0   ;;  %s795_s27 = smov 0  }
  0x11 LB: > { %s475_s0 = sadd.s32 4294967295, %s743_s27   ;;  %s476_s28 = sadd.s32 4294967294, %s743_s27   ;;  %s743_s27 = sphi %s795_s27, %s21_s27   ;;  %s739_s26 = sphi %s793_s26, %s978_s26   ;;  %s735_s25 = sphi %s791_s25, %s977_s25   ;;  %s731_s24 = sphi %s789_s24, %s976_s24   ;;  %s727_s23 = sphi %s787_s23, %s975_s23   ;;  %s723_s22 = sphi %s785_s22, %s974_s22  }
  0x12   : > { %s33_s29 = sadd.s32 1, %s739_s26  ;;  %s40_s30 = sadd.s32 1, %s731_s24 }
  0x13   : > { %p35_p3 = scmp.ge.s32.totalorder %s33_s29, 2  ;;  %p53_p4 = scmp.ne.s32.totalorder %s727_s23, %s723_s22 }
  0x14   : > { %p104_p5 = scmp.ne.s32.totalorder %s731_s24, %s727_s23  ;;  %p54_p6 = scmp.eq.s32.totalorder %s475_s0, 0 }
  0x15   : > { %s980_s29 = smov (%p35_p3, %s33_s29), 0  ;;  %p105_p7 = scmp.eq.s32.totalorder %s475_s0, 1 }
  0x16   : > { %s37_s4 = ssub.s32 %s739_s26, %s980_s29  ;;  %p111_p8 = scmp.eq.s32.totalorder %s476_s28, 1 }
  0x17   : > { %p38_p9 = scmp.eq.s32.totalorder %s37_s4, 0  ;;  %p827_p10 = por %p105_p7, %p104_p5 }
  0x18   : > { %p831_p11 = por %p111_p8, %p53_p4  ;;  %p477_p12 = scmp.ge.s32.totalorder %s743_s27, 1 }
  0x19   : > { %s965_s5 = scalar_select %p827_p10, 1, 0 }
  0x1a   : > { %s966_s6 = scalar_select %p831_p11, 1, 0 }
  0x1b   : > { %s837_s7 = scalar_select %p38_p9, %s731_s24, %s40_s30  }
  0x1c   : > { %p839_p13 = por %p54_p6, %p53_p4  ;;  %p118_p0 = scmp.lt.s32.totalorder %s743_s27, 3 }
  0x1d   : > { %s498_s9 = sshll.u32 %s735_s25, 10  ;;  %s746_s11 = smov [#allocation4]  }
  0x1e   : > { %s967_s8 = scalar_select %p839_p13, 1, 0 }
  0x1f   : > { %p845_p1 = pnand %p477_p12, %p118_p0  ;;  %s133_s12 = sshll.u32 %s746_s11, 4  ;;  %s856_s12 = int_to_ptr.vmem [resolvable:$true] %s133_s12 }
  0x20   : > { %s854_s15 = scalar_lea.hbm %s958_s1, %s498_s9  ;;  %s634_s20 = scalar_lea.hbm %s958_s1, 2048 }
  0x21   : > { %s968_s10 = scalar_select %p845_p1, 1, 0 }
  0x22   : > { %p535_p2 = pneg %p845_p1  ;;  %s629_s17 = scalar_lea.hbm %s854_s15, 1024 }
  0x23   : > { %p630_p4 = scmp.ne.s32.totalorder %s854_s15, %s629_s17  ;;  %p635_p8 = scmp.lt.u32.totalorder %s854_s15, %s958_s1 }
  0x24   : > { %p860_p3 = pnand %p535_p2, %p839_p13  ;;  %p636_p9 = scmp.lt.u32.totalorder %s634_s20, %s629_s17 }
  0x25   : > { %p638_p0 = scmp.lt.u32.totalorder %s629_s17, %s854_s15 }
  0x26   : > { %p631_p5 = pneg %p860_p3  ;;  %p637_p12 = por %p636_p9, %p635_p8 }
  0x28   : > { %p632_p6 = pnand %p631_p5, %p630_p4  ;;  %p639_p2 = por %p638_p0, %p637_p12 }
  0x2a   : > { %p633_p7 = pneg %p632_p6 }
  0x2c   : > { %p640_p11 = pnand %p639_p2, %p633_p7 }
  0x2e   : > { %643 = shalt.err (!%p640_p11)
}
  0x2f   : > { %s644_s28 = scalar_lea.vmem %s856_s12, 1024  ;;  %p652_p13 = scmp.lt.s32.totalorder %s856_s12, %s856_s12 }
  0x30   : > { %p645_p4 = scmp.ne.s32.totalorder %s856_s12, %s644_s28  ;;  %p653_p1 = scmp.lt.s32.totalorder %s644_s28, %s644_s28 }
  0x32   : > { %p647_p6 = pnand %p645_p4, %p631_p5  ;;  %p654_p8 = por %p653_p1, %p652_p13 }
  0x34   : > { %p648_p10 = pneg %p647_p6 }
  0x36   : > { %p655_p9 = pnand %p654_p8, %p648_p10 }
  0x38   : > { %658 = shalt.err (!%p655_p9)
}
  0x39   : > { %s747_s30 = smov 64   ;;  %s748_s4 = smov 4  }
  0x3a   : > { %538 = dma.hbm_to_vmem [thread:$0]  (!%p860_p3), %s854_s15, 1024, %s856_s12, [#allocation5], %s747_s30, %s747_s30, %s748_s4  }
  0x3b   : > { %p970_p11 = scmp.ne.s32.totalorder %s968_s10, 0 }
  0x3c   : > { %p971_p7 = scmp.ne.s32.totalorder (!%p970_p11), %s967_s8, 0 }
  0x3d   : > { %156 = sbr.rel (%p970_p11) target bundleno = 480 (0x1e0), region = 28 }
  0x44   : > { %714 = dma.done.wait (%p971_p7), [#allocation5], 1024  }
  0x45   : > { %716 = vsyncadd (%p971_p7), [#allocation5], 4294966272  ;;  %p177_p10 = scmp.lt.s32.totalorder %s735_s25, 1  ;;  %v203_v0 = vlaneseq  ;;  %s201_s9 = sld [smem:[#allocation3 + %s735_s25]]  ;;  %v599_v9 = vld [vmem:[#allocation4] sm:$0xff]   ;;  %v749_v10 = vmov 0.0  }
  0x46   : > { %v600_v14 = vld [vmem:[#allocation4 + $0x8] sm:$0xff]   ;;  %509 = vmatprep.subr.bf16.mxu0 %v599_v9  ;;  %v601_v19 = vld [vmem:[#allocation4 + $0x10] sm:$0xff]   ;;  %v602_v26 = vld [vmem:[#allocation4 + $0x18] sm:$0xff]   ;;  %s174_s8 = sand.u32 1, %s727_s23   ;;  %s530_s16 = smul.u32 384, %s735_s25 }
  0x47   : > { %s178_s11 = scalar_select %p177_p10, %s735_s25, 1  ;;  %v204_v1 = vshrl.u32 %v203_v0, 7  ;;  %510 = vmatpush3.bf16.msra.mxu0 %v599_v9  ;;  %v603_v27 = vld [vmem:[#allocation4 + $0x20] sm:$0xff]   ;;  %v604_v28 = vld [vmem:[#allocation4 + $0x28] sm:$0xff]   ;;  %v605_v29 = vld [vmem:[#allocation4 + $0x30] sm:$0xff]  }
  0x48   : > { %511 = vmatprep.subr.bf16.mxu0 %v600_v14  ;;  %v606_v30 = vld [vmem:[#allocation4 + $0x38] sm:$0xff]   ;;  %s529_s15 = smul.u32 24, %s174_s8  ;;  %s909_s20 = scalar_lea.hbm %s960_s3, %s530_s16 }
  0x49   : > { %s481_s13 = sshll.u32 %s178_s11, 1  ;;  %v205_v2 = vadd.s32 8, %v204_v1  ;;  %v206_v3 = vadd.s32 16, %v204_v1  ;;  %v211_v4 = vcvt.s32.f32 %v204_v1  ;;  %s911_s21 = scalar_lea.sflag [#allocation6], %s174_s8 }
  0x4a   : > { %s180_s14 = scalar_lea.vmem %s959_s2, %s481_s13  ;;  %s176_s17 = scalar_lea.vmem [#allocation7], %s529_s15 }
  0x4b   : > { %v212_v5 = vcvt.s32.f32 %v205_v2  ;;  %v213_v6 = vcvt.s32.f32 %v206_v3  ;;  %v485_v7 = vld [vmem:[%s180_s14] ss:$0 sm:$0xff]  ;;  %v214_v8 = vstv %s201_s9  ;;  %v486_v15 = vld [vmem:[%s180_s14 + $0x1] ss:$0 sm:$0xff]  ;;  %512 = vmatpush3.bf16.msra.mxu0 %v600_v14  ;;  %s385_s18 = sshll.u32 %s176_s17, 4  ;;  %p972_p1 = scmp.ne.s32.totalorder %s965_s5, 0  ;;  %s904_s18 = int_to_ptr.vmem [resolvable:$true] %s385_s18 }
  0x4c   : > { %vm215_vm0 = vcmp.lt.s32.totalorder %v204_v1, %v214_v8  ;;  %vm216_vm1 = vcmp.lt.s32.totalorder %v205_v2, %v214_v8  ;;  %vm217_vm2 = vcmp.lt.s32.totalorder %v206_v3, %v214_v8  ;;  %513 = vmatprep.subr.bf16.mxu0 %v601_v19  ;;  %s659_s0 = scalar_lea.vmem %s904_s18, 384  ;;  %s750_s28 = smov [#allocation7]  }
  0x4d   : > { %v482_v11 = vsel %vm215_vm0, 1.0, %v749_v10  ;;  %v483_v12 = vsel %vm216_vm1, 1.0, %v749_v10  ;;  %v484_v13 = vsel %vm217_vm2, 1.0, %v749_v10  ;;  %p660_p13 = scmp.ne.s32.totalorder %s904_s18, %s659_s0  ;;  %s663_s30 = sshll.u32 %s750_s28, 4  ;;  %s664_s30 = int_to_ptr.vmem [resolvable:$false] %s663_s30 }
  0x4e   : > { %v224_v16 = vmul.f32 %v482_v11, %v211_v4  ;;  %v225_v17 = vmul.f32 %v483_v12, %v212_v5  ;;  %v226_v18 = vmul.f32 %v484_v13, %v213_v6  ;;  %s665_s4 = scalar_lea.vmem %s664_s30, 768  ;;  %p666_p12 = scmp.lt.s32.totalorder %s904_s18, %s664_s30 }
  0x4f   : > { %514 = vmatpush3.bf16.msra.mxu0 %v601_v19  ;;  %p661_p3 = pnand %p660_p13, %p972_p1  ;;  %p667_p0 = scmp.lt.s32.totalorder %s665_s4, %s659_s0 }
  0x50   : > { %v231_v20 = vmul.f32 %v485_v7, %v224_v16  ;;  %v232_v21 = vmul.f32 %v485_v7, %v225_v17  ;;  %v233_v22 = vmul.f32 %v485_v7, %v226_v18  ;;  %515 = vmatprep.subr.bf16.mxu0 %v602_v26 }
  0x51   : > { %p662_p5 = pneg %p661_p3  ;;  %p668_p2 = por %p667_p0, %p666_p12 }
  0x52   : > { %v238_v23 = vsub.f32 %v231_v20, %v486_v15  ;;  %v240_v24 = vsub.f32 %v233_v22, %v486_v15  ;;  %v239_v25 = vsub.f32 %v232_v21, %v486_v15 }
  0x53   : > { %516 = vmatpush3.bf16.msra.mxu0 %v602_v26  ;;  %p669_p4 = pnand %p668_p2, %p662_p5 }
  0x54   : > { %241 = vmax.xlane.f32.xlu0 %v238_v23  ;;  %245 = vmax.xlane.f32.xlu1 %v240_v24 }
  0x55   : > { %517 = vmatprep.subr.bf16.mxu0 %v603_v27 }
  0x57   : > { %518 = vmatpush3.bf16.msra.mxu0 %v603_v27 }
  0x58   : > { %243 = vmax.xlane.f32.xlu0 %v239_v25  ;;  %519 = vmatprep.subr.bf16.mxu0 %v604_v28 }
  0x5b   : > { %520 = vmatpush3.bf16.msra.mxu0 %v604_v28 }
  0x5c   : > { %521 = vmatprep.subr.bf16.mxu0 %v605_v29 }
  0x5f   : > { %522 = vmatpush3.bf16.msra.mxu0 %v605_v29 }
  0x60   : > { %523 = vmatprep.subr.bf16.mxu0 %v606_v30 }
  0x63   : > { %524 = vmatpush3.bf16.msra.mxu0 %v606_v30 }
  0xe1   : > { %v242_v31 = vpop.xlane.xlu0 %241  ;;  %v246_v32 = vpop.xlane.xlu1 %245 }
  0xe2   : > { %v247_v33 = vsub.f32 %v238_v23, %v242_v31  ;;  %v249_v34 = vsub.f32 %v240_v24, %v246_v32 }
  0xe4   : > { %v250_v35 = vmul.f32 1.442695, %v247_v33  ;;  %v254_v36 = vmul.f32 1.442695, %v249_v34 }
  0xe5   : > { %v244_v37 = vpop.xlane.xlu0 %243 }
  0xe6   : > { %607 = vpow2.f32 %v250_v35  ;;  %v248_v38 = vsub.f32 %v239_v25, %v244_v37 }
  0xe7   : > { %609 = vpow2.f32 %v254_v36 }
  0xe8   : > { %v252_v39 = vmul.f32 1.442695, %v248_v38 }
  0xea   : > { %611 = vpow2.f32 %v252_v39 }
  0xf0   : > { %v608_v40 = vpop.eup %607 }
  0xf1   : > { %v610_v41 = vpop.eup %609  ;;  %256 = vadd.xlane.f32.xlu1 %v608_v40 }
  0xf2   : > { %v263_v43 = vpack.c.bf16 %v610_v41, %v610_v41 }
  0xf4   : > { %v612_v42 = vpop.eup %611 }
  0xf5   : > { %258 = vadd.xlane.f32.xlu0 %v612_v42  ;;  %260 = vadd.xlane.f32.xlu1 %v610_v41  ;;  %v262_v44 = vpack.c.bf16 %v612_v42, %v608_v40 }
  0xf7   : > { %525 = vmatprep.mubr.bf16.mxu0 %v262_v44 }
  0xf8   : > { %526 = vmatmul.mubr.bf16.vlgmr.msra.gmra.mrb[0].mxu0 %v263_v43 }
 0x17e   : > { %v257_v45 = vpop.xlane.xlu1 %256 }
 0x182   : > { %v261_v46 = vpop.xlane.xlu1 %260  ;;  %v259_v47 = vpop.xlane.xlu0 %258 }
 0x183   : > { %613 = vrcp.f32 %v261_v46 }
 0x184   : > { %615 = vrcp.f32 %v257_v45 }
 0x185   : > { %617 = vrcp.f32 %v259_v47 }
 0x18d   : > { %v614_v48 = vpop.eup %613 }
 0x18e   : > { %v616_v50 = vpop.eup %615 }
 0x18f   : > { %v618_v55 = vpop.eup %617 }
 0x1cb   : > { %v527_v49 = vpop.f32.mrb[0].mxu0 }
 0x1cc   : > { %v365_v51 = vmul.f32 %v614_v48, %v527_v49  ;;  %v346_v52 = vpop.f32.mrb[1].mxu0 }
 0x1cd   : > { %v363_v53 = vmul.f32 %v616_v50, %v346_v52  ;;  %v528_v54 = vpop.f32.mrb[2].mxu0 }
 0x1ce   : > { %368 = vst [vmem:[%s176_s17 + $0x10] sm:$0xff] %v365_v51  ;;  %v349_v56 = vpop.f32.mrb[3].mxu0 }
 0x1cf   : > { %366 = vst [vmem:[%s176_s17] sm:$0xff] %v363_v53  ;;  %v364_v57 = vmul.f32 %v618_v55, %v349_v56 }
 0x1d1   : > { %367 = vst [vmem:[%s176_s17 + $0x8] sm:$0xff] %v364_v57 }
 0x1d2   : > { %672 = shalt.err (!%p669_p4)
}
 0x1d3   : > { %s673_s9 = scalar_lea.hbm %s909_s20, 384  ;;  %s677_s12 = scalar_lea.hbm %s960_s3, 768 }
 0x1d4   : > { %p674_p6 = scmp.ne.s32.totalorder %s909_s20, %s673_s9  ;;  %p678_p11 = scmp.lt.u32.totalorder %s909_s20, %s960_s3 }
 0x1d5   : > { %p679_p7 = scmp.lt.u32.totalorder %s677_s12, %s673_s9  ;;  %p681_p13 = scmp.lt.u32.totalorder %s673_s9, %s909_s20 }
 0x1d6   : > { %p675_p8 = pnand %p674_p6, %p972_p1 }
 0x1d7   : > { %p680_p10 = por %p679_p7, %p678_p11 }
 0x1d8   : > { %p676_p9 = pneg %p675_p8 }
 0x1d9   : > { %p682_p3 = por %p681_p13, %p680_p10 }
 0x1db   : > { %p683_p5 = pnand %p682_p3, %p676_p9 }
 0x1dd   : > { %686 = shalt.err (!%p683_p5)
}
 0x1de   : > { %s751_s8 = smov 128   ;;  %s752_s15 = smov 8  }
 0x1df   : > { %533 = dma.vmem_to_hbm [thread:$0]  (%p972_p1), %s904_s18, 384, %s909_s20, %s911_s21, %s751_s8, %s751_s8, %s752_s15  }
 0x1e0 PF: > { %p543_p12 = scmp.ge.s32.totalorder %s743_s27, 2  ;;  %s400_s16 = sand.u32 1, %s723_s22  }
 0x1e1   : > { %p973_p0 = scmp.ne.s32.totalorder %s966_s6, 0  ;;  %s401_s17 = scalar_lea.sflag [#allocation6], %s400_s16 }
 0x1e3   : > { %p540_p2 = pnand %p543_p12, %p973_p0 }
 0x1e5   : > { %718 = dma.done.wait (!%p540_p2), %s401_s17, 384  }
 0x1e6   : > { %720 = vsyncadd (!%p540_p2), %s401_s17, 4294966912  ;;  %s21_s27 = sadd.s32 1, %s743_s27   ;;  %s974_s22 = smov %s727_s23 }
 0x1e7   : > { %p18_p4 = scmp.ge.s32.totalorder %s21_s27, 4   ;;  %s975_s23 = smov %s731_s24 }
 0x1e8   : > { %s976_s24 = smov %s837_s7  ;;  %s977_s25 = smov %s739_s26 }
 0x1e9   : > { %s978_s26 = smov %s980_s29  ;;  %20 = sbr.rel (!%p18_p4) target bundleno = 17 (0x11), region = 69 }
 0x1f0   :  { %406 = vsyncpa [#allocation5], 1 }
 0x1f1   :  { %408 = vsyncpa [#allocation5 + $0x1], 1 }
 0x1f2   :  { %409 = vsyncpa [#allocation6], 1 }
 0x1f3   :  { %411 = vsyncpa [#allocation6 + $0x1], 1 }

// kernel: tpu_custom_call.1
= control target key start
LH: loop header
LB: loop body
LE: loop exit
PB: predicated region body
PF: predicated region fallthrough
CT: control target
= control target key end

     0   :  { %s1003_s0 = inlined_call_operand.hbm [shape: s32[2], index: 0, kind: input, shape index: {}]   ;;  %s1004_s1 = inlined_call_operand.hbm [shape: bf16[2,128,128], index: 1, kind: input, shape index: {}]   ;;  %s1005_s2 = inlined_call_operand.vmem [shape: f32[2,2,128], index: 2, kind: input, shape index: {}]   ;;  %s1006_s3 = inlined_call_operand.hbm [shape: f32[2,24,128], index: 3, kind: output, shape index: {}]  }
   0x1   :  { %s645_s14 = scalar_lea.hbm %s1003_s0, 16 }
   0x2   :  { %p646_p0 = scmp.ne.s32.totalorder %s1003_s0, %s645_s14  ;;  %p649_p1 = scmp.lt.u32.totalorder %s645_s14, %s1003_s0 }
   0x4   :  { %p651_p2 = pnand %p649_p1, %p646_p0 }
   0x6   :  { %654 = shalt.err (!%p651_p2)  }
   0x7   :  { %s771_s19 = smov [#allocation3]  }
   0x8   :  { %9 = dma.hbm_to_smem %s1003_s0, 16, %s771_s19, [#allocation2] }
   0x9   :  { %737 = dma.done.wait [#allocation2], 16 }
   0xa   :  { %738 = vsyncadd [#allocation2], 4294967280 }
   0xb   :  { %11 = sfence }
   0xc   :  { %12 = vsyncpa [#allocation5], 0 }
   0xd   :  { %14 = vsyncpa [#allocation5 + $0x1], 0 }
   0xe   :  { %15 = vsyncpa [#allocation6], 0 }
   0xf   :  { %17 = vsyncpa [#allocation6 + $0x1], 0  ;;  %s811_s22 = smov 0   ;;  %s813_s23 = smov 0  }
  0x10   :  { %s815_s24 = smov 0   ;;  %s817_s25 = smov 0  }
  0x11   :  { %s819_s26 = smov 0   ;;  %s821_s27 = smov 0  }
  0x12 LB: > { %s498_s0 = sadd.s32 4294967295, %s769_s27   ;;  %s499_s28 = sadd.s32 4294967294, %s769_s27   ;;  %s769_s27 = sphi %s821_s27, %s23_s27   ;;  %s765_s26 = sphi %s819_s26, %s1021_s26   ;;  %s761_s25 = sphi %s817_s25, %s1020_s25   ;;  %s757_s24 = sphi %s815_s24, %s1019_s24   ;;  %s753_s23 = sphi %s813_s23, %s1018_s23   ;;  %s749_s22 = sphi %s811_s22, %s1017_s22  }
  0x13   : > { %s35_s29 = sadd.s32 1, %s765_s26  ;;  %s42_s30 = sadd.s32 1, %s757_s24 }
  0x14   : > { %p37_p3 = scmp.ge.s32.totalorder %s35_s29, 2  ;;  %p49_p4 = scmp.ne.s32.totalorder %s757_s24, %s753_s23 }
  0x15   : > { %p50_p5 = scmp.eq.s32.totalorder %s769_s27, 0  ;;  %p55_p6 = scmp.ne.s32.totalorder %s753_s23, %s749_s22 }
  0x16   : > { %s1023_s29 = smov (%p37_p3, %s35_s29), 0  ;;  %p56_p8 = scmp.eq.s32.totalorder %s498_s0, 0 }
  0x17   : > { %p852_p7 = por %p50_p5, %p49_p4  ;;  %s39_s5 = ssub.s32 %s765_s26, %s1023_s29 }
  0x18   : > { %p107_p9 = scmp.eq.s32.totalorder %s498_s0, 1  ;;  %p40_p10 = scmp.eq.s32.totalorder %s39_s5, 0 }
  0x19   : > { %p858_p11 = por %p56_p8, %p55_p6  ;;  %p113_p13 = scmp.eq.s32.totalorder %s499_s28, 1 }
  0x1a   : > { %p862_p12 = por %p107_p9, %p49_p4  ;;  %p569_p2 = scmp.lt.s32.totalorder %s769_s27, 2 }
  0x1b   : > { %s867_s8 = scalar_select %p40_p10, %s757_s24, %s42_s30  }
  0x1c   : > { %s1010_s7 = scalar_select %p862_p12, 1, 0 }
  0x1d   : > { %p869_p0 = por %p113_p13, %p55_p6  ;;  %s133_s10 = sand.u32 1, %s757_s24  }
  0x1e   : > { %s502_s11 = sshll.u32 %s133_s10, 6  ;;  %s524_s12 = sshll.u32 %s765_s26, 10 }
  0x1f   : > { %s1011_s9 = scalar_select %p869_p0, 1, 0 }
  0x20   : > { %s880_s15 = scalar_lea.hbm %s1004_s1, %s524_s12  ;;  %s137_s16 = scalar_lea.vmem [#allocation4], %s502_s11 }
  0x21   : > { %s144_s17 = sshll.u32 %s137_s16, 4  ;;  %p886_p3 = pnand %p569_p2, %p852_p7  ;;  %s882_s17 = int_to_ptr.vmem [resolvable:$true] %s144_s17 }
  0x22   : > { %s891_s19 = scalar_lea.sflag [#allocation5], %s133_s10  ;;  %s655_s20 = scalar_lea.hbm %s880_s15, 1024 }
  0x23   : > { %p656_p5 = scmp.ne.s32.totalorder %s880_s15, %s655_s20  ;;  %p657_p6 = pneg %p886_p3 }
  0x24   : > { %s660_s28 = scalar_lea.hbm %s1004_s1, 2048  ;;  %p661_p7 = scmp.lt.u32.totalorder %s880_s15, %s1004_s1 }
  0x25   : > { %p658_p8 = pnand %p657_p6, %p656_p5  ;;  %p662_p10 = scmp.lt.u32.totalorder %s660_s28, %s655_s20 }
  0x26   : > { %p664_p2 = scmp.lt.u32.totalorder %s655_s20, %s880_s15 }
  0x27   : > { %p659_p9 = pneg %p658_p8  ;;  %p663_p13 = por %p662_p10, %p661_p7 }
  0x29   : > { %p665_p1 = por %p664_p2, %p663_p13 }
  0x2b   : > { %p666_p4 = pnand %p665_p1, %p659_p9 }
  0x2d   : > { %669 = shalt.err (!%p666_p4)
}
  0x2e   : > { %s670_s5 = scalar_lea.vmem %s882_s17, 1024  ;;  %s772_s10 = smov [#allocation4]  }
  0x2f   : > { %p671_p5 = scmp.ne.s32.totalorder %s882_s17, %s670_s5  ;;  %s675_s11 = sshll.u32 %s772_s10, 4  ;;  %s676_s11 = int_to_ptr.vmem [resolvable:$false] %s675_s11 }
  0x30   : > { %s677_s12 = scalar_lea.vmem %s676_s11, 2048  ;;  %p678_p12 = scmp.lt.s32.totalorder %s882_s17, %s676_s11 }
  0x31   : > { %p673_p8 = pnand %p671_p5, %p657_p6  ;;  %p679_p7 = scmp.lt.s32.totalorder %s677_s12, %s670_s5 }
  0x33   : > { %p674_p0 = pneg %p673_p8  ;;  %p680_p10 = por %p679_p7, %p678_p12 }
  0x35   : > { %p681_p13 = pnand %p680_p10, %p674_p0 }
  0x37   : > { %684 = shalt.err (!%p681_p13)
}
  0x38   : > { %s773_s13 = smov 64   ;;  %s774_s14 = smov 4  }
  0x39   : > { %564 = dma.hbm_to_vmem [thread:$0]  (!%p886_p3), %s880_s15, 1024, %s882_s17, %s891_s19, %s773_s13, %s773_s13, %s774_s14  }
  0x3a   : > { %p159_p1 = scmp.lt.s32.totalorder %s769_s27, 3  ;;  %p1013_p4 = scmp.ge.s32.totalorder %s769_s27, 1 }
  0x3c   : > { %p160_p6 = pnand %p1013_p4, %p159_p1 }
  0x3d   : > { %s923_s16 = sand.u32 (!%p160_p6), 1, %s753_s23  }
  0x3e   : > { %163 = sbr.rel (%p160_p6) target bundleno = 481 (0x1e1), region = 28  ;;  %s506_s20 = sshll.u32 (!%p160_p6), %s923_s16, 6 }
  0x3f   : > { %s166_s21 = scalar_lea.sflag (!%p160_p6), [#allocation5], %s923_s16  ;;  %s927_s0 = scalar_lea.vmem (!%p160_p6), [#allocation4], %s506_s20 }
  0x45   : > { %740 = dma.done.wait (%p858_p11), %s166_s21, 1024  }
  0x46   : > { %742 = vsyncadd (%p858_p11), %s166_s21, 4294966272  ;;  %p194_p12 = scmp.lt.s32.totalorder %s761_s25, 1  ;;  %v220_v0 = vlaneseq  ;;  %s218_s15 = sld [smem:[#allocation3 + %s761_s25]]  ;;  %v625_v9 = vld [vmem:[%s927_s0] sm:$0xff]   ;;  %v775_v10 = vmov 0.0   ;;  %v626_v14 = vld [vmem:[%s927_s0 + $0x8] sm:$0xff]  }
  0x47   : > { %535 = vmatprep.subr.bf16.mxu0 %v625_v9  ;;  %v627_v19 = vld [vmem:[%s927_s0 + $0x10] sm:$0xff]   ;;  %v628_v26 = vld [vmem:[%s927_s0 + $0x18] sm:$0xff]   ;;  %v629_v27 = vld [vmem:[%s927_s0 + $0x20] sm:$0xff]   ;;  %s555_s6 = smul.u32 24, %s923_s16  ;;  %s387_s13 = scalar_lea.sflag [#allocation6], %s923_s16 }
  0x48   : > { %s195_s17 = scalar_select %p194_p12, %s761_s25, 1  ;;  %v221_v1 = vshrl.u32 %v220_v0, 7  ;;  %536 = vmatpush3.bf16.msra.mxu0 %v625_v9  ;;  %v630_v28 = vld [vmem:[%s927_s0 + $0x28] sm:$0xff]   ;;  %v631_v29 = vld [vmem:[%s927_s0 + $0x30] sm:$0xff]   ;;  %v632_v30 = vld [vmem:[%s927_s0 + $0x38] sm:$0xff]  }
  0x49   : > { %537 = vmatprep.subr.bf16.mxu0 %v626_v14  ;;  %s193_s4 = scalar_lea.vmem [#allocation7], %s555_s6  ;;  %s556_s10 = smul.u32 384, %s761_s25 }
  0x4a   : > { %s507_s18 = sshll.u32 %s195_s17, 1  ;;  %v222_v2 = vadd.s32 8, %v221_v1  ;;  %v223_v3 = vadd.s32 16, %v221_v1  ;;  %v228_v4 = vcvt.s32.f32 %v221_v1  ;;  %s402_s5 = sshll.u32 %s193_s4, 4  ;;  %s949_s5 = int_to_ptr.vmem [resolvable:$true] %s402_s5 }
  0x4b   : > { %s197_s30 = scalar_lea.vmem %s1005_s2, %s507_s18  ;;  %s954_s25 = scalar_lea.hbm %s1006_s3, %s556_s10 }
  0x4c   : > { %v229_v5 = vcvt.s32.f32 %v222_v2  ;;  %v230_v6 = vcvt.s32.f32 %v223_v3  ;;  %v511_v7 = vld [vmem:[%s197_s30] ss:$0 sm:$0xff]  ;;  %v231_v8 = vstv %s218_s15  ;;  %v512_v15 = vld [vmem:[%s197_s30 + $0x1] ss:$0 sm:$0xff]  ;;  %538 = vmatpush3.bf16.msra.mxu0 %v626_v14  ;;  %s685_s14 = scalar_lea.vmem %s949_s5, 384  ;;  %p1014_p0 = scmp.ne.s32.totalorder %s1010_s7, 0 }
  0x4d   : > { %vm232_vm0 = vcmp.lt.s32.totalorder %v221_v1, %v231_v8  ;;  %vm233_vm1 = vcmp.lt.s32.totalorder %v222_v2, %v231_v8  ;;  %vm234_vm2 = vcmp.lt.s32.totalorder %v223_v3, %v231_v8  ;;  %539 = vmatprep.subr.bf16.mxu0 %v627_v19  ;;  %p686_p11 = scmp.ne.s32.totalorder %s949_s5, %s685_s14  ;;  %s776_s20 = smov [#allocation7]  }
  0x4e   : > { %v508_v11 = vsel %vm232_vm0, 1.0, %v775_v10  ;;  %v509_v12 = vsel %vm233_vm1, 1.0, %v775_v10  ;;  %v510_v13 = vsel %vm234_vm2, 1.0, %v775_v10  ;;  %s689_s21 = sshll.u32 %s776_s20, 4  ;;  %s690_s21 = int_to_ptr.vmem [resolvable:$false] %s689_s21 }
  0x4f   : > { %v241_v16 = vmul.f32 %v508_v11, %v228_v4  ;;  %v242_v17 = vmul.f32 %v509_v12, %v229_v5  ;;  %v243_v18 = vmul.f32 %v510_v13, %v230_v6  ;;  %p687_p3 = pnand %p686_p11, %p1014_p0  ;;  %s691_s0 = scalar_lea.vmem %s690_s21, 768 }
  0x50   : > { %540 = vmatpush3.bf16.msra.mxu0 %v627_v19  ;;  %p692_p2 = scmp.lt.s32.totalorder %s949_s5, %s690_s21  ;;  %p693_p5 = scmp.lt.s32.totalorder %s691_s0, %s685_s14 }
  0x51   : > { %v248_v20 = vmul.f32 %v511_v7, %v241_v16  ;;  %v249_v21 = vmul.f32 %v511_v7, %v242_v17  ;;  %v250_v22 = vmul.f32 %v511_v7, %v243_v18  ;;  %541 = vmatprep.subr.bf16.mxu0 %v628_v26  ;;  %p688_p9 = pneg %p687_p3 }
  0x52   : > { %p694_p8 = por %p693_p5, %p692_p2 }
  0x53   : > { %v255_v23 = vsub.f32 %v248_v20, %v512_v15  ;;  %v257_v24 = vsub.f32 %v250_v22, %v512_v15  ;;  %v256_v25 = vsub.f32 %v249_v21, %v512_v15 }
  0x54   : > { %542 = vmatpush3.bf16.msra.mxu0 %v628_v26  ;;  %p695_p7 = pnand %p694_p8, %p688_p9 }
  0x55   : > { %258 = vmax.xlane.f32.xlu0 %v255_v23  ;;  %262 = vmax.xlane.f32.xlu1 %v257_v24 }
  0x56   : > { %543 = vmatprep.subr.bf16.mxu0 %v629_v27 }
  0x58   : > { %544 = vmatpush3.bf16.msra.mxu0 %v629_v27 }
  0x59   : > { %260 = vmax.xlane.f32.xlu0 %v256_v25  ;;  %545 = vmatprep.subr.bf16.mxu0 %v630_v28 }
  0x5c   : > { %546 = vmatpush3.bf16.msra.mxu0 %v630_v28 }
  0x5d   : > { %547 = vmatprep.subr.bf16.mxu0 %v631_v29 }
  0x60   : > { %548 = vmatpush3.bf16.msra.mxu0 %v631_v29 }
  0x61   : > { %549 = vmatprep.subr.bf16.mxu0 %v632_v30 }
  0x64   : > { %550 = vmatpush3.bf16.msra.mxu0 %v632_v30 }
  0xe2   : > { %v259_v31 = vpop.xlane.xlu0 %258  ;;  %v263_v32 = vpop.xlane.xlu1 %262 }
  0xe3   : > { %v264_v33 = vsub.f32 %v255_v23, %v259_v31  ;;  %v266_v34 = vsub.f32 %v257_v24, %v263_v32 }
  0xe5   : > { %v267_v35 = vmul.f32 1.442695, %v264_v33  ;;  %v271_v36 = vmul.f32 1.442695, %v266_v34 }
  0xe6   : > { %v261_v37 = vpop.xlane.xlu0 %260 }
  0xe7   : > { %633 = vpow2.f32 %v267_v35  ;;  %v265_v38 = vsub.f32 %v256_v25, %v261_v37 }
  0xe8   : > { %635 = vpow2.f32 %v271_v36 }
  0xe9   : > { %v269_v39 = vmul.f32 1.442695, %v265_v38 }
  0xeb   : > { %637 = vpow2.f32 %v269_v39 }
  0xf1   : > { %v634_v40 = vpop.eup %633 }
  0xf2   : > { %v636_v41 = vpop.eup %635  ;;  %273 = vadd.xlane.f32.xlu1 %v634_v40 }
  0xf3   : > { %v280_v43 = vpack.c.bf16 %v636_v41, %v636_v41 }
  0xf5   : > { %v638_v42 = vpop.eup %637 }
  0xf6   : > { %275 = vadd.xlane.f32.xlu0 %v638_v42  ;;  %277 = vadd.xlane.f32.xlu1 %v636_v41  ;;  %v279_v44 = vpack.c.bf16 %v638_v42, %v634_v40 }
  0xf8   : > { %551 = vmatprep.mubr.bf16.mxu0 %v279_v44 }
  0xf9   : > { %552 = vmatmul.mubr.bf16.vlgmr.msra.gmra.mrb[0].mxu0 %v280_v43 }
 0x17f   : > { %v274_v45 = vpop.xlane.xlu1 %273 }
 0x183   : > { %v278_v46 = vpop.xlane.xlu1 %277  ;;  %v276_v47 = vpop.xlane.xlu0 %275 }
 0x184   : > { %639 = vrcp.f32 %v278_v46 }
 0x185   : > { %641 = vrcp.f32 %v274_v45 }
 0x186   : > { %643 = vrcp.f32 %v276_v47 }
 0x18e   : > { %v640_v48 = vpop.eup %639 }
 0x18f   : > { %v642_v50 = vpop.eup %641 }
 0x190   : > { %v644_v55 = vpop.eup %643 }
 0x1cc   : > { %v553_v49 = vpop.f32.mrb[0].mxu0 }
 0x1cd   : > { %v382_v51 = vmul.f32 %v640_v48, %v553_v49  ;;  %v363_v52 = vpop.f32.mrb[1].mxu0 }
 0x1ce   : > { %v380_v53 = vmul.f32 %v642_v50, %v363_v52  ;;  %v554_v54 = vpop.f32.mrb[2].mxu0 }
 0x1cf   : > { %385 = vst [vmem:[%s193_s4 + $0x10] sm:$0xff] %v382_v51  ;;  %v366_v56 = vpop.f32.mrb[3].mxu0 }
 0x1d0   : > { %383 = vst [vmem:[%s193_s4] sm:$0xff] %v380_v53  ;;  %v381_v57 = vmul.f32 %v644_v55, %v366_v56 }
 0x1d2   : > { %384 = vst [vmem:[%s193_s4 + $0x8] sm:$0xff] %v381_v57 }
 0x1d3   : > { %698 = shalt.err (!%p695_p7)
}
 0x1d4   : > { %s699_s15 = scalar_lea.hbm %s954_s25, 384  ;;  %s703_s19 = scalar_lea.hbm %s1006_s3, 768 }
 0x1d5   : > { %p700_p10 = scmp.ne.s32.totalorder %s954_s25, %s699_s15  ;;  %p704_p4 = scmp.lt.u32.totalorder %s954_s25, %s1006_s3 }
 0x1d6   : > { %p705_p6 = scmp.lt.u32.totalorder %s703_s19, %s699_s15  ;;  %p707_p11 = scmp.lt.u32.totalorder %s699_s15, %s954_s25 }
 0x1d7   : > { %p701_p13 = pnand %p700_p10, %p1014_p0 }
 0x1d8   : > { %p706_p12 = por %p705_p6, %p704_p4 }
 0x1d9   : > { %p702_p1 = pneg %p701_p13 }
 0x1da   : > { %p708_p3 = por %p707_p11, %p706_p12 }
 0x1dc   : > { %p709_p9 = pnand %p708_p3, %p702_p1 }
 0x1de   : > { %712 = shalt.err (!%p709_p9)
}
 0x1df   : > { %s777_s6 = smov 128   ;;  %s778_s4 = smov 8  }
 0x1e0   : > { %559 = dma.vmem_to_hbm [thread:$0]  (%p1014_p0), %s949_s5, 384, %s954_s25, %s387_s13, %s777_s6, %s777_s6, %s778_s4  }
 0x1e1 PF: > { %s417_s10 = sand.u32 1, %s749_s22   ;;  %p1015_p2 = scmp.ne.s32.totalorder %s1011_s9, 0 }
 0x1e2   : > { %p1016_p5 = scmp.ge.s32.totalorder %s769_s27, 2  ;;  %s418_s11 = scalar_lea.sflag [#allocation6], %s417_s10 }
 0x1e4   : > { %p566_p8 = pnand %p1016_p5, %p1015_p2 }
 0x1e6   : > { %744 = dma.done.wait (!%p566_p8), %s418_s11, 384  }
 0x1e7   : > { %746 = vsyncadd (!%p566_p8), %s418_s11, 4294966912  ;;  %s23_s27 = sadd.s32 1, %s769_s27   ;;  %s1017_s22 = smov %s753_s23 }
 0x1e8   : > { %p20_p7 = scmp.ge.s32.totalorder %s23_s27, 4   ;;  %s1018_s23 = smov %s757_s24 }
 0x1e9   : > { %s1019_s24 = smov %s867_s8  ;;  %s1020_s25 = smov %s765_s26 }
 0x1ea   : > { %s1021_s26 = smov %s1023_s29  ;;  %22 = sbr.rel (!%p20_p7) target bundleno = 18 (0x12), region = 76 }
 0x1f1   :  { %423 = vsyncpa [#allocation5], 1 }
 0x1f2   :  { %425 = vsyncpa [#allocation5 + $0x1], 1 }
 0x1f3   :  { %426 = vsyncpa [#allocation6], 1 }
 0x1f4   :  { %428 = vsyncpa [#allocation6 + $0x1], 1 }

</bundles_post_ra>
